<compile_context>
chip_gen: v6e
topology: v6e:2x2x1
jax: 0.10.0
libtpu: 0.0.40
codegen_flags: <defaults>
</compile_context>

<pallas_src>
import functools
from itertools import combinations

import numpy as np
import jax
import jax.numpy as jnp
from jax import lax
from jax.experimental import pallas as pl
from jax.experimental.pallas import tpu as pltpu

_TWO_PI = float(2.0 * np.pi)
_VMEM_LIMIT_BYTES = 32 * 1024 * 1024


def _round_up(x, m):
    return ((x + m - 1) // m) * m


def _cdiv(a, b):
    return (a + b - 1) // b


# ----------------------------------------------------------------------------
# Pallas kernels
# ----------------------------------------------------------------------------
def _face_kernel(corner_ref, o_ref, *, angle_scale, det_scale):
    # corner_ref: (104, FT)  13 planes (12 corner components + mask), each an
    #             aligned 8-sublane block -> all math on dense (8, FT) tiles.
    # o_ref:      (8, FT)    per-core partial-sum accumulator, resident across
    #             the inner ("arbitrary") grid axis; reduced once in wrapper.

    def plane(k):                      # aligned (8, FT) view, zero-cost slice
        return corner_ref[8 * k:8 * (k + 1), :]

    mask = plane(12)                   # 1 valid face / 0 padded
    safe = 1.0 - mask                  # keeps rsqrt away from 0 on padded faces

    corners = [[plane(3 * c + d) for d in range(3)] for c in range(4)]

    # normalized edges e_c = normalize(corner[c+1] - corner[c]); rsqrt on EUP
    edges = []
    for c in range(4):
        a = corners[c]
        b = corners[(c + 1) % 4]
        d0, d1, d2 = b[0] - a[0], b[1] - a[1], b[2] - a[2]
        inv = lax.rsqrt(d0 * d0 + d1 * d1 + d2 * d2 + safe)
        edges.append((d0 * inv, d1 * inv, d2 * inv))

    def dot3(u, v):
        return u[0] * v[0] + u[1] * v[1] + u[2] * v[2]

    def cross3(u, v):
        return (u[1] * v[2] - u[2] * v[1],
                u[2] * v[0] - u[0] * v[2],
                u[0] * v[1] - u[1] * v[0])

    def acos(x):
        # clamp (f32 rounding can push |dot| past 1), then the exact identity
        # acos(x) = atan2(sqrt(1 - x^2), x) for |x| <= 1.
        xc = jnp.clip(x, -1.0, 1.0)
        return jnp.arctan2(jnp.sqrt(1.0 - xc * xc), xc)

    # interior angles reuse the 4 normalized edges: ba = -e_{c-1}, bc = e_c
    planarity = -_TWO_PI
    for c in range(4):
        planarity = planarity + acos(-dot3(edges[(c + 3) % 4], edges[c]))

    # determinant term: 3 shared cross products + 4 scalar triple products
    e0, e1, e2, e3 = edges
    c12, c13, c23 = cross3(e1, e2), cross3(e1, e3), cross3(e2, e3)
    d012, d013 = dot3(e0, c12), dot3(e0, c13)
    d023, d123 = dot3(e0, c23), dot3(e1, c23)
    det_sq = d012 * d012 + d013 * d013 + d023 * d023 + d123 * d123

    contrib = mask * (angle_scale * (planarity * planarity) + det_scale * det_sq)

    @pl.when(pl.program_id(1) == 0)
    def _():
        o_ref[...] = jnp.zeros_like(o_ref)

    o_ref[...] += contrib              # pure VPU add, no per-step reduction


def _closeness_kernel(v_ref, o_ref):
    # v_ref: (56, VT)  rows [0:24) weights xyz planes, [24:48) init_pos xyz
    #        planes, [48:56) voronoi weights (each an 8-sublane block).
    # o_ref: (8, VT)   resident accumulator of per-vertex contributions.
    # Faithful to the reference einsum('ij,ik->', d, d) = sum_v w_v*(dx+dy+dz)^2
    # (possibly an upstream bug, kept as-is).  Padded vertices have vw = 0.
    d = ((v_ref[0:8, :] - v_ref[24:32, :])
         + (v_ref[8:16, :] - v_ref[32:40, :])
         + (v_ref[16:24, :] - v_ref[40:48, :]))
    rs = jnp.sqrt(v_ref[48:56, :]) * d

    @pl.when(pl.program_id(0) == 0)
    def _():
        o_ref[...] = jnp.zeros_like(o_ref)

    o_ref[...] += rs * rs


# ----------------------------------------------------------------------------
# Host-side wrapper: packing, padding, pallas_call
# ----------------------------------------------------------------------------
def build_objective_fn(faces_np, *, closeness_w, angle_w, det_w,
                       surface_area, num_faces):
    faces_np = np.asarray(faces_np, np.int32)
    assert faces_np.ndim == 2 and faces_np.shape[1] == 4, "only quad faces supported"
    F = int(faces_np.shape[0])

    # --- face tiling: 2 'parallel' halves (v7x TCs) x n_half lane blocks ------
    FT = min(1024, _round_up(max(_cdiv(F, 16), 1), 128))   # lanes per face block
    n_half = _cdiv(F, 2 * 8 * FT)                          # blocks per half
    Fl = 2 * n_half * FT                                   # total folded lanes
    Fpad = 8 * Fl                                          # total face slots

    # --- static gather indices + mask planes (numpy -> jit constants) --------
    faces_pad = np.zeros((Fpad, 4), np.int32)
    faces_pad[:F] = faces_np
    idx = 3 * faces_pad[:, :, None] + np.arange(3, dtype=np.int32)[None, None, :]
    idx = idx.reshape(Fpad, 12).T.reshape(96, Fl)          # plane k at rows [8k,8k+8)
    mask = np.zeros((Fpad,), np.float32)
    mask[:F] = 1.0
    mask = mask.reshape(8, Fl)
    idx_const = jnp.asarray(idx)
    mask_const = jnp.asarray(mask)

    face_kernel = functools.partial(
        _face_kernel,
        angle_scale=float(angle_w) / float(num_faces),
        det_scale=float(det_w) / float(num_faces))
    closeness_scale = float(closeness_w) / float(surface_area) ** 2

    face_call = pl.pallas_call(
        face_kernel,
        out_shape=jax.ShapeDtypeStruct((16, FT), jnp.float32),
        grid_spec=pltpu.PrefetchScalarGridSpec(
            num_scalar_prefetch=0,
            grid=(2, n_half),
            in_specs=[pl.BlockSpec((104, FT), lambda p, i: (0, p * n_half + i))],
            out_specs=pl.BlockSpec((8, FT), lambda p, i: (p, 0)),
        ),
        compiler_params=pltpu.CompilerParams(
            dimension_semantics=("parallel", "arbitrary"),
            vmem_limit_bytes=_VMEM_LIMIT_BYTES),
    )

    @jax.jit
    def objective(weights, init_pos, vertex_weights):
        w = jnp.asarray(weights, jnp.float32)
        x0 = jnp.asarray(init_pos, jnp.float32)
        vw = jnp.asarray(vertex_weights, jnp.float32)
        V = w.shape[0]

        # -------- closeness term: separate tiny kernel over vertices ---------
        VT = min(2048, _round_up(max(_cdiv(V, 8), 1), 128))
        nvb = _cdiv(_cdiv(V, 8), VT)
        Vl = nvb * VT
        Vpad = 8 * Vl

        wp = jnp.pad(w, ((0, Vpad - V), (0, 0)))
        x0p = jnp.pad(x0, ((0, Vpad - V), (0, 0)))
        vwp = jnp.pad(vw, ((0, Vpad - V),))
        vert_slab = jnp.concatenate(
            [wp.T.reshape(24, Vl), x0p.T.reshape(24, Vl), vwp.reshape(8, Vl)],
            axis=0)                                               # (56, Vl)

        c_out = pl.pallas_call(
            _closeness_kernel,
            out_shape=jax.ShapeDtypeStruct((8, VT), jnp.float32),
            grid_spec=pltpu.PrefetchScalarGridSpec(
                num_scalar_prefetch=0,
                grid=(nvb,),
                in_specs=[pl.BlockSpec((56, VT), lambda i: (0, i))],
                out_specs=pl.BlockSpec((8, VT), lambda i: (0, 0)),
            ),
            compiler_params=pltpu.CompilerParams(
                dimension_semantics=("arbitrary",),
                vmem_limit_bytes=_VMEM_LIMIT_BYTES),
        )(vert_slab)
        closeness = jnp.sum(c_out)

        # -------- per-face terms: single gather -> dense plane slab ----------
        gathered = jnp.take(w.reshape(-1), idx_const, mode="clip")  # (96, Fl)
        corner_slab = jnp.concatenate([gathered, mask_const], axis=0)  # (104, Fl)
        f_out = face_call(corner_slab)                                # (16, FT)

        return closeness_scale * closeness + jnp.sum(f_out)

    return objective


# ----------------------------------------------------------------------------
# Pure-JAX reference (mirrors the PyTorch forward, used for validation only)
# ----------------------------------------------------------------------------
def objective_reference(weights, init_pos, vertex_weights, faces_np, *,
                        closeness_w, angle_w, det_w, surface_area, num_faces):
    dist = weights - init_pos
    dist = jnp.sqrt(vertex_weights)[:, None] * dist
    closeness = jnp.einsum('ij,ik->', dist, dist)
    angle_term = 0.0
    det_term = 0.0
    n = 4
    for f in range(faces_np.shape[0]):
        vids = faces_np[f]
        planarity = -(n - 2) * np.pi
        for i in range(n):
            va = weights[int(vids[(i + n - 1) % n])]
            vb = weights[int(vids[i])]
            vc = weights[int(vids[(i + 1) % n])]
            ba = (va - vb) / jnp.sqrt((va - vb) @ (va - vb))
            bc = (vc - vb) / jnp.sqrt((vc - vb) @ (vc - vb))
            planarity = planarity + jnp.arccos(ba @ bc)
        angle_term = angle_term + planarity ** 2
        edges = []
        for i in range(n):
            va = weights[int(vids[i])]
            vb = weights[int(vids[(i + 1) % n])]
            edges.append((vb - va) / jnp.linalg.norm(vb - va))
        for a, b, c in combinations(edges, 3):
            det_term = det_term + jnp.square(jnp.linalg.det(jnp.stack((a, b, c))))
    return (closeness_w * closeness / surface_area ** 2
            + angle_w * angle_term / num_faces
            + det_w * det_term / num_faces)


# ----------------------------------------------------------------------------
# Deterministic synthetic mesh (stands in for the Blender bmesh)
# ----------------------------------------------------------------------------
def _triangle_area(a, b, c):
    return 0.5 * np.linalg.norm(np.cross(b - a, c - a))


def build_quad_mesh(nx=3, ny=3):
    verts = []
    for j in range(ny + 1):
        for i in range(nx + 1):
            x, y = float(i), float(j)
            z = 0.3 * np.sin(0.9 * x) * np.cos(0.7 * y)
            verts.append([x, y, z])
    verts = np.asarray(verts, np.float32)
    faces = []
    for j in range(ny):
        for i in range(nx):
            v00 = j * (nx + 1) + i
            faces.append([v00, v00 + 1, v00 + nx + 2, v00 + nx + 1])
    faces = np.asarray(faces, np.int32)
    vertex_weights = np.zeros((verts.shape[0],), np.float64)
    surface_area = 0.0
    for f in faces:
        p = verts[f].astype(np.float64)
        area = _triangle_area(p[0], p[1], p[2]) + _triangle_area(p[0], p[2], p[3])
        surface_area += area
        for vid in f:
            vertex_weights[vid] += area / 4.0   # deterministic voronoi-area stand-in
    return verts, faces, vertex_weights.astype(np.float32), float(surface_area)


if __name__ == "__main__":
    init_pos_np, faces_np, vw_np, surface_area = build_quad_mesh(3, 3)
    num_faces = int(faces_np.shape[0])            # 9 quad faces
    closeness_w, angle_w, det_w = 1.0, 0.5, 0.25  # objective hyper-parameters

    init_pos = jnp.asarray(init_pos_np)           # (16, 3)
    vertex_weights = jnp.asarray(vw_np)           # (16,)
    # nn.Parameter `weights` initialized from the vertex positions, plus a
    # deterministic perturbation so every energy term is non-trivial.
    key = jax.random.PRNGKey(0)
    weights = init_pos + 0.05 * jax.random.normal(key, init_pos.shape, jnp.float32)

    objective = build_objective_fn(
        faces_np, closeness_w=closeness_w, angle_w=angle_w, det_w=det_w,
        surface_area=surface_area, num_faces=num_faces)

    energy = jax.block_until_ready(objective(weights, init_pos, vertex_weights))

    ref = objective_reference(
        weights, init_pos, vertex_weights, faces_np,
        closeness_w=closeness_w, angle_w=angle_w, det_w=det_w,
        surface_area=surface_area, num_faces=num_faces)

    assert np.isfinite(float(energy)), "kernel produced non-finite energy"
    np.testing.assert_allclose(float(energy), float(ref), rtol=3e-3, atol=1e-5)
    print("KERNEL_OK")
</pallas_src>

<mosaic_0001>
module attributes {stable_mosaic.version = 11 : i64} {
  func.func @_face_kernel(%arg0: i32, %arg1: i32, %arg2: memref<104x128xf32, #tpu.memory_space<vmem>>, %arg3: memref<8x128xf32, #tpu.memory_space<vmem>>) attributes {dimension_semantics = [#tpu.dimension_semantics<parallel>, #tpu.dimension_semantics<arbitrary>], iteration_bounds = array<i64: 2, 1>, scalar_prefetch = 0 : i64, scratch_operands = 0 : i64, tpu.core_type = #tpu.core_type<tc>, window_params = [{transform_indices = @transform_0, window_bounds = array<i64: 104, 128>}, {transform_indices = @transform_1, window_bounds = array<i64: 8, 128>}]} {
    %c96 = arith.constant 96 : index
    %c0 = arith.constant 0 : index
    %0 = vector.load %arg2[%c96, %c0] : memref<104x128xf32, #tpu.memory_space<vmem>>, vector<8x128xf32>
    %cst = arith.constant 1.000000e+00 : f32
    %1 = vector.broadcast %cst : f32 to vector<8x128xf32>
    %2 = arith.subf %1, %0 : vector<8x128xf32>
    %c0_0 = arith.constant 0 : index
    %c0_1 = arith.constant 0 : index
    %3 = vector.load %arg2[%c0_0, %c0_1] : memref<104x128xf32, #tpu.memory_space<vmem>>, vector<8x128xf32>
    %c8 = arith.constant 8 : index
    %c0_2 = arith.constant 0 : index
    %4 = vector.load %arg2[%c8, %c0_2] : memref<104x128xf32, #tpu.memory_space<vmem>>, vector<8x128xf32>
    %c16 = arith.constant 16 : index
    %c0_3 = arith.constant 0 : index
    %5 = vector.load %arg2[%c16, %c0_3] : memref<104x128xf32, #tpu.memory_space<vmem>>, vector<8x128xf32>
    %c24 = arith.constant 24 : index
    %c0_4 = arith.constant 0 : index
    %6 = vector.load %arg2[%c24, %c0_4] : memref<104x128xf32, #tpu.memory_space<vmem>>, vector<8x128xf32>
    %c32 = arith.constant 32 : index
    %c0_5 = arith.constant 0 : index
    %7 = vector.load %arg2[%c32, %c0_5] : memref<104x128xf32, #tpu.memory_space<vmem>>, vector<8x128xf32>
    %c40 = arith.constant 40 : index
    %c0_6 = arith.constant 0 : index
    %8 = vector.load %arg2[%c40, %c0_6] : memref<104x128xf32, #tpu.memory_space<vmem>>, vector<8x128xf32>
    %c48 = arith.constant 48 : index
    %c0_7 = arith.constant 0 : index
    %9 = vector.load %arg2[%c48, %c0_7] : memref<104x128xf32, #tpu.memory_space<vmem>>, vector<8x128xf32>
    %c56 = arith.constant 56 : index
    %c0_8 = arith.constant 0 : index
    %10 = vector.load %arg2[%c56, %c0_8] : memref<104x128xf32, #tpu.memory_space<vmem>>, vector<8x128xf32>
    %c64 = arith.constant 64 : index
    %c0_9 = arith.constant 0 : index
    %11 = vector.load %arg2[%c64, %c0_9] : memref<104x128xf32, #tpu.memory_space<vmem>>, vector<8x128xf32>
    %c72 = arith.constant 72 : index
    %c0_10 = arith.constant 0 : index
    %12 = vector.load %arg2[%c72, %c0_10] : memref<104x128xf32, #tpu.memory_space<vmem>>, vector<8x128xf32>
    %c80 = arith.constant 80 : index
    %c0_11 = arith.constant 0 : index
    %13 = vector.load %arg2[%c80, %c0_11] : memref<104x128xf32, #tpu.memory_space<vmem>>, vector<8x128xf32>
    %c88 = arith.constant 88 : index
    %c0_12 = arith.constant 0 : index
    %14 = vector.load %arg2[%c88, %c0_12] : memref<104x128xf32, #tpu.memory_space<vmem>>, vector<8x128xf32>
    %15 = arith.subf %6, %3 : vector<8x128xf32>
    %16 = arith.subf %7, %4 : vector<8x128xf32>
    %17 = arith.subf %8, %5 : vector<8x128xf32>
    %18 = arith.mulf %15, %15 : vector<8x128xf32>
    %19 = arith.mulf %16, %16 : vector<8x128xf32>
    %20 = arith.addf %18, %19 : vector<8x128xf32>
    %21 = arith.mulf %17, %17 : vector<8x128xf32>
    %22 = arith.addf %20, %21 : vector<8x128xf32>
    %23 = arith.addf %22, %2 : vector<8x128xf32>
    %24 = math.rsqrt %23 : vector<8x128xf32>
    %25 = arith.mulf %15, %24 : vector<8x128xf32>
    %26 = arith.mulf %16, %24 : vector<8x128xf32>
    %27 = arith.mulf %17, %24 : vector<8x128xf32>
    %28 = arith.subf %9, %6 : vector<8x128xf32>
    %29 = arith.subf %10, %7 : vector<8x128xf32>
    %30 = arith.subf %11, %8 : vector<8x128xf32>
    %31 = arith.mulf %28, %28 : vector<8x128xf32>
    %32 = arith.mulf %29, %29 : vector<8x128xf32>
    %33 = arith.addf %31, %32 : vector<8x128xf32>
    %34 = arith.mulf %30, %30 : vector<8x128xf32>
    %35 = arith.addf %33, %34 : vector<8x128xf32>
    %36 = arith.addf %35, %2 : vector<8x128xf32>
    %37 = math.rsqrt %36 : vector<8x128xf32>
    %38 = arith.mulf %28, %37 : vector<8x128xf32>
    %39 = arith.mulf %29, %37 : vector<8x128xf32>
    %40 = arith.mulf %30, %37 : vector<8x128xf32>
    %41 = arith.subf %12, %9 : vector<8x128xf32>
    %42 = arith.subf %13, %10 : vector<8x128xf32>
    %43 = arith.subf %14, %11 : vector<8x128xf32>
    %44 = arith.mulf %41, %41 : vector<8x128xf32>
    %45 = arith.mulf %42, %42 : vector<8x128xf32>
    %46 = arith.addf %44, %45 : vector<8x128xf32>
    %47 = arith.mulf %43, %43 : vector<8x128xf32>
    %48 = arith.addf %46, %47 : vector<8x128xf32>
    %49 = arith.addf %48, %2 : vector<8x128xf32>
    %50 = math.rsqrt %49 : vector<8x128xf32>
    %51 = arith.mulf %41, %50 : vector<8x128xf32>
    %52 = arith.mulf %42, %50 : vector<8x128xf32>
    %53 = arith.mulf %43, %50 : vector<8x128xf32>
    %54 = arith.subf %3, %12 : vector<8x128xf32>
    %55 = arith.subf %4, %13 : vector<8x128xf32>
    %56 = arith.subf %5, %14 : vector<8x128xf32>
    %57 = arith.mulf %54, %54 : vector<8x128xf32>
    %58 = arith.mulf %55, %55 : vector<8x128xf32>
    %59 = arith.addf %57, %58 : vector<8x128xf32>
    %60 = arith.mulf %56, %56 : vector<8x128xf32>
    %61 = arith.addf %59, %60 : vector<8x128xf32>
    %62 = arith.addf %61, %2 : vector<8x128xf32>
    %63 = math.rsqrt %62 : vector<8x128xf32>
    %64 = arith.mulf %54, %63 : vector<8x128xf32>
    %65 = arith.mulf %55, %63 : vector<8x128xf32>
    %66 = arith.mulf %56, %63 : vector<8x128xf32>
    %67 = arith.mulf %64, %25 : vector<8x128xf32>
    %68 = arith.mulf %65, %26 : vector<8x128xf32>
    %69 = arith.addf %67, %68 : vector<8x128xf32>
    %70 = arith.mulf %66, %27 : vector<8x128xf32>
    %71 = arith.addf %69, %70 : vector<8x128xf32>
    %cst_13 = arith.constant 0.000000e+00 : f32
    %72 = vector.broadcast %cst_13 : f32 to vector<8x128xf32>
    %73 = arith.subf %72, %71 : vector<8x128xf32>
    %cst_14 = arith.constant -1.000000e+00 : f32
    %cst_15 = arith.constant 1.000000e+00 : f32
    %74 = vector.broadcast %cst_14 : f32 to vector<8x128xf32>
    %75 = arith.maximumf %74, %73 : vector<8x128xf32>
    %76 = vector.broadcast %cst_15 : f32 to vector<8x128xf32>
    %77 = arith.minimumf %76, %75 : vector<8x128xf32>
    %78 = arith.mulf %77, %77 : vector<8x128xf32>
    %cst_16 = arith.constant 1.000000e+00 : f32
    %79 = vector.broadcast %cst_16 : f32 to vector<8x128xf32>
    %80 = arith.subf %79, %78 : vector<8x128xf32>
    %81 = math.sqrt %80 : vector<8x128xf32>
    %82 = math.atan2 %81, %77 : vector<8x128xf32>
    %cst_17 = arith.constant -6.28318548 : f32
    %83 = vector.broadcast %cst_17 : f32 to vector<8x128xf32>
    %84 = arith.addf %83, %82 : vector<8x128xf32>
    %85 = arith.mulf %25, %38 : vector<8x128xf32>
    %86 = arith.mulf %26, %39 : vector<8x128xf32>
    %87 = arith.addf %85, %86 : vector<8x128xf32>
    %88 = arith.mulf %27, %40 : vector<8x128xf32>
    %89 = arith.addf %87, %88 : vector<8x128xf32>
    %cst_18 = arith.constant 0.000000e+00 : f32
    %90 = vector.broadcast %cst_18 : f32 to vector<8x128xf32>
    %91 = arith.subf %90, %89 : vector<8x128xf32>
    %cst_19 = arith.constant -1.000000e+00 : f32
    %cst_20 = arith.constant 1.000000e+00 : f32
    %92 = vector.broadcast %cst_19 : f32 to vector<8x128xf32>
    %93 = arith.maximumf %92, %91 : vector<8x128xf32>
    %94 = vector.broadcast %cst_20 : f32 to vector<8x128xf32>
    %95 = arith.minimumf %94, %93 : vector<8x128xf32>
    %96 = arith.mulf %95, %95 : vector<8x128xf32>
    %cst_21 = arith.constant 1.000000e+00 : f32
    %97 = vector.broadcast %cst_21 : f32 to vector<8x128xf32>
    %98 = arith.subf %97, %96 : vector<8x128xf32>
    %99 = math.sqrt %98 : vector<8x128xf32>
    %100 = math.atan2 %99, %95 : vector<8x128xf32>
    %101 = arith.addf %84, %100 : vector<8x128xf32>
    %102 = arith.mulf %38, %51 : vector<8x128xf32>
    %103 = arith.mulf %39, %52 : vector<8x128xf32>
    %104 = arith.addf %102, %103 : vector<8x128xf32>
    %105 = arith.mulf %40, %53 : vector<8x128xf32>
    %106 = arith.addf %104, %105 : vector<8x128xf32>
    %cst_22 = arith.constant 0.000000e+00 : f32
    %107 = vector.broadcast %cst_22 : f32 to vector<8x128xf32>
    %108 = arith.subf %107, %106 : vector<8x128xf32>
    %cst_23 = arith.constant -1.000000e+00 : f32
    %cst_24 = arith.constant 1.000000e+00 : f32
    %109 = vector.broadcast %cst_23 : f32 to vector<8x128xf32>
    %110 = arith.maximumf %109, %108 : vector<8x128xf32>
    %111 = vector.broadcast %cst_24 : f32 to vector<8x128xf32>
    %112 = arith.minimumf %111, %110 : vector<8x128xf32>
    %113 = arith.mulf %112, %112 : vector<8x128xf32>
    %cst_25 = arith.constant 1.000000e+00 : f32
    %114 = vector.broadcast %cst_25 : f32 to vector<8x128xf32>
    %115 = arith.subf %114, %113 : vector<8x128xf32>
    %116 = math.sqrt %115 : vector<8x128xf32>
    %117 = math.atan2 %116, %112 : vector<8x128xf32>
    %118 = arith.addf %101, %117 : vector<8x128xf32>
    %119 = arith.mulf %51, %64 : vector<8x128xf32>
    %120 = arith.mulf %52, %65 : vector<8x128xf32>
    %121 = arith.addf %119, %120 : vector<8x128xf32>
    %122 = arith.mulf %53, %66 : vector<8x128xf32>
    %123 = arith.addf %121, %122 : vector<8x128xf32>
    %cst_26 = arith.constant 0.000000e+00 : f32
    %124 = vector.broadcast %cst_26 : f32 to vector<8x128xf32>
    %125 = arith.subf %124, %123 : vector<8x128xf32>
    %cst_27 = arith.constant -1.000000e+00 : f32
    %cst_28 = arith.constant 1.000000e+00 : f32
    %126 = vector.broadcast %cst_27 : f32 to vector<8x128xf32>
    %127 = arith.maximumf %126, %125 : vector<8x128xf32>
    %128 = vector.broadcast %cst_28 : f32 to vector<8x128xf32>
    %129 = arith.minimumf %128, %127 : vector<8x128xf32>
    %130 = arith.mulf %129, %129 : vector<8x128xf32>
    %cst_29 = arith.constant 1.000000e+00 : f32
    %131 = vector.broadcast %cst_29 : f32 to vector<8x128xf32>
    %132 = arith.subf %131, %130 : vector<8x128xf32>
    %133 = math.sqrt %132 : vector<8x128xf32>
    %134 = math.atan2 %133, %129 : vector<8x128xf32>
    %135 = arith.addf %118, %134 : vector<8x128xf32>
    %136 = arith.mulf %39, %53 : vector<8x128xf32>
    %137 = arith.mulf %40, %52 : vector<8x128xf32>
    %138 = arith.subf %136, %137 : vector<8x128xf32>
    %139 = arith.mulf %40, %51 : vector<8x128xf32>
    %140 = arith.mulf %38, %53 : vector<8x128xf32>
    %141 = arith.subf %139, %140 : vector<8x128xf32>
    %142 = arith.mulf %38, %52 : vector<8x128xf32>
    %143 = arith.mulf %39, %51 : vector<8x128xf32>
    %144 = arith.subf %142, %143 : vector<8x128xf32>
    %145 = arith.mulf %39, %66 : vector<8x128xf32>
    %146 = arith.mulf %40, %65 : vector<8x128xf32>
    %147 = arith.subf %145, %146 : vector<8x128xf32>
    %148 = arith.mulf %40, %64 : vector<8x128xf32>
    %149 = arith.mulf %38, %66 : vector<8x128xf32>
    %150 = arith.subf %148, %149 : vector<8x128xf32>
    %151 = arith.mulf %38, %65 : vector<8x128xf32>
    %152 = arith.mulf %39, %64 : vector<8x128xf32>
    %153 = arith.subf %151, %152 : vector<8x128xf32>
    %154 = arith.mulf %52, %66 : vector<8x128xf32>
    %155 = arith.mulf %53, %65 : vector<8x128xf32>
    %156 = arith.subf %154, %155 : vector<8x128xf32>
    %157 = arith.mulf %53, %64 : vector<8x128xf32>
    %158 = arith.mulf %51, %66 : vector<8x128xf32>
    %159 = arith.subf %157, %158 : vector<8x128xf32>
    %160 = arith.mulf %51, %65 : vector<8x128xf32>
    %161 = arith.mulf %52, %64 : vector<8x128xf32>
    %162 = arith.subf %160, %161 : vector<8x128xf32>
    %163 = arith.mulf %25, %138 : vector<8x128xf32>
    %164 = arith.mulf %26, %141 : vector<8x128xf32>
    %165 = arith.addf %163, %164 : vector<8x128xf32>
    %166 = arith.mulf %27, %144 : vector<8x128xf32>
    %167 = arith.addf %165, %166 : vector<8x128xf32>
    %168 = arith.mulf %25, %147 : vector<8x128xf32>
    %169 = arith.mulf %26, %150 : vector<8x128xf32>
    %170 = arith.addf %168, %169 : vector<8x128xf32>
    %171 = arith.mulf %27, %153 : vector<8x128xf32>
    %172 = arith.addf %170, %171 : vector<8x128xf32>
    %173 = arith.mulf %25, %156 : vector<8x128xf32>
    %174 = arith.mulf %26, %159 : vector<8x128xf32>
    %175 = arith.addf %173, %174 : vector<8x128xf32>
    %176 = arith.mulf %27, %162 : vector<8x128xf32>
    %177 = arith.addf %175, %176 : vector<8x128xf32>
    %178 = arith.mulf %38, %156 : vector<8x128xf32>
    %179 = arith.mulf %39, %159 : vector<8x128xf32>
    %180 = arith.addf %178, %179 : vector<8x128xf32>
    %181 = arith.mulf %40, %162 : vector<8x128xf32>
    %182 = arith.addf %180, %181 : vector<8x128xf32>
    %183 = arith.mulf %167, %167 : vector<8x128xf32>
    %184 = arith.mulf %172, %172 : vector<8x128xf32>
    %185 = arith.addf %183, %184 : vector<8x128xf32>
    %186 = arith.mulf %177, %177 : vector<8x128xf32>
    %187 = arith.addf %185, %186 : vector<8x128xf32>
    %188 = arith.mulf %182, %182 : vector<8x128xf32>
    %189 = arith.addf %187, %188 : vector<8x128xf32>
    %190 = arith.mulf %135, %135 : vector<8x128xf32>
    %cst_30 = arith.constant 0.055555556 : f32
    %191 = vector.broadcast %cst_30 : f32 to vector<8x128xf32>
    %192 = arith.mulf %191, %190 : vector<8x128xf32>
    %cst_31 = arith.constant 0.027777778 : f32
    %193 = vector.broadcast %cst_31 : f32 to vector<8x128xf32>
    %194 = arith.mulf %193, %189 : vector<8x128xf32>
    %195 = arith.addf %192, %194 : vector<8x128xf32>
    %196 = arith.mulf %0, %195 : vector<8x128xf32>
    %c0_i32 = arith.constant 0 : i32
    %197 = arith.cmpi eq, %arg1, %c0_i32 : i32
    %198 = arith.extui %197 : i1 to i32
    %c0_i32_32 = arith.constant 0 : i32
    %199 = arith.cmpi ne, %198, %c0_i32_32 : i32
    scf.if %199 {
      %cst_37 = arith.constant 0.000000e+00 : f32
      %203 = vector.broadcast %cst_37 : f32 to vector<8x128xf32>
      %c0_38 = arith.constant 0 : index
      %c0_39 = arith.constant 0 : index
      %204 = vector.load %arg3[%c0_38, %c0_39] : memref<8x128xf32, #tpu.memory_space<vmem>>, vector<8x128xf32>
      tpu.vector_store %arg3[%c0_38, %c0_39], %203 {strides = array<i32>} : memref<8x128xf32, #tpu.memory_space<vmem>>, vector<8x128xf32>,
    } else {
    }
    %c0_33 = arith.constant 0 : index
    %c0_34 = arith.constant 0 : index
    %200 = vector.load %arg3[%c0_33, %c0_34] : memref<8x128xf32, #tpu.memory_space<vmem>>, vector<8x128xf32>
    %201 = arith.addf %200, %196 : vector<8x128xf32>
    %c0_35 = arith.constant 0 : index
    %c0_36 = arith.constant 0 : index
    %202 = vector.load %arg3[%c0_35, %c0_36] : memref<8x128xf32, #tpu.memory_space<vmem>>, vector<8x128xf32>
    tpu.vector_store %arg3[%c0_35, %c0_36], %201 {strides = array<i32>} : memref<8x128xf32, #tpu.memory_space<vmem>>, vector<8x128xf32>,
    return
  }
  func.func @transform_0(%arg0: i32, %arg1: i32) -> (i32, i32) {
    %c1_i32 = arith.constant 1 : i32
    %0 = arith.muli %arg0, %c1_i32 : i32
    %1 = arith.addi %0, %arg1 : i32
    %c0_i32 = arith.constant 0 : i32
    %c0_i32_0 = arith.constant 0 : i32
    return %c0_i32, %1 : i32, i32
  }
  func.func @transform_1(%arg0: i32, %arg1: i32) -> (i32, i32) {
    %c0_i32 = arith.constant 0 : i32
    %c0_i32_0 = arith.constant 0 : i32
    return %arg0, %c0_i32 : i32, i32
  }
}

module attributes {stable_mosaic.version = 11 : i64} {
  func.func @_closeness_kernel(%arg0: i32, %arg1: memref<56x128xf32, #tpu.memory_space<vmem>>, %arg2: memref<8x128xf32, #tpu.memory_space<vmem>>) attributes {dimension_semantics = [#tpu.dimension_semantics<arbitrary>], iteration_bounds = array<i64: 1>, scalar_prefetch = 0 : i64, scratch_operands = 0 : i64, tpu.core_type = #tpu.core_type<tc>, window_params = [{transform_indices = @transform_0, window_bounds = array<i64: 56, 128>}, {pipeline_mode = #tpu.pipeline_mode<synchronous>, transform_indices = @transform_1, window_bounds = array<i64: 8, 128>}]} {
    %c0 = arith.constant 0 : index
    %c0_0 = arith.constant 0 : index
    %0 = vector.load %arg1[%c0, %c0_0] : memref<56x128xf32, #tpu.memory_space<vmem>>, vector<8x128xf32>
    %c24 = arith.constant 24 : index
    %c0_1 = arith.constant 0 : index
    %1 = vector.load %arg1[%c24, %c0_1] : memref<56x128xf32, #tpu.memory_space<vmem>>, vector<8x128xf32>
    %2 = arith.subf %0, %1 : vector<8x128xf32>
    %c8 = arith.constant 8 : index
    %c0_2 = arith.constant 0 : index
    %3 = vector.load %arg1[%c8, %c0_2] : memref<56x128xf32, #tpu.memory_space<vmem>>, vector<8x128xf32>
    %c32 = arith.constant 32 : index
    %c0_3 = arith.constant 0 : index
    %4 = vector.load %arg1[%c32, %c0_3] : memref<56x128xf32, #tpu.memory_space<vmem>>, vector<8x128xf32>
    %5 = arith.subf %3, %4 : vector<8x128xf32>
    %6 = arith.addf %2, %5 : vector<8x128xf32>
    %c16 = arith.constant 16 : index
    %c0_4 = arith.constant 0 : index
    %7 = vector.load %arg1[%c16, %c0_4] : memref<56x128xf32, #tpu.memory_space<vmem>>, vector<8x128xf32>
    %c40 = arith.constant 40 : index
    %c0_5 = arith.constant 0 : index
    %8 = vector.load %arg1[%c40, %c0_5] : memref<56x128xf32, #tpu.memory_space<vmem>>, vector<8x128xf32>
    %9 = arith.subf %7, %8 : vector<8x128xf32>
    %10 = arith.addf %6, %9 : vector<8x128xf32>
    %c48 = arith.constant 48 : index
    %c0_6 = arith.constant 0 : index
    %11 = vector.load %arg1[%c48, %c0_6] : memref<56x128xf32, #tpu.memory_space<vmem>>, vector<8x128xf32>
    %12 = math.sqrt %11 : vector<8x128xf32>
    %13 = arith.mulf %12, %10 : vector<8x128xf32>
    %c0_i32 = arith.constant 0 : i32
    %14 = arith.cmpi eq, %arg0, %c0_i32 : i32
    %15 = arith.extui %14 : i1 to i32
    %c0_i32_7 = arith.constant 0 : i32
    %16 = arith.cmpi ne, %15, %c0_i32_7 : i32
    scf.if %16 {
      %cst = arith.constant 0.000000e+00 : f32
      %21 = vector.broadcast %cst : f32 to vector<8x128xf32>
      %c0_12 = arith.constant 0 : index
      %c0_13 = arith.constant 0 : index
      %22 = vector.load %arg2[%c0_12, %c0_13] : memref<8x128xf32, #tpu.memory_space<vmem>>, vector<8x128xf32>
      tpu.vector_store %arg2[%c0_12, %c0_13], %21 {strides = array<i32>} : memref<8x128xf32, #tpu.memory_space<vmem>>, vector<8x128xf32>,
    } else {
    }
    %c0_8 = arith.constant 0 : index
    %c0_9 = arith.constant 0 : index
    %17 = vector.load %arg2[%c0_8, %c0_9] : memref<8x128xf32, #tpu.memory_space<vmem>>, vector<8x128xf32>
    %18 = arith.mulf %13, %13 : vector<8x128xf32>
    %19 = arith.addf %17, %18 : vector<8x128xf32>
    %c0_10 = arith.constant 0 : index
    %c0_11 = arith.constant 0 : index
    %20 = vector.load %arg2[%c0_10, %c0_11] : memref<8x128xf32, #tpu.memory_space<vmem>>, vector<8x128xf32>
    tpu.vector_store %arg2[%c0_10, %c0_11], %19 {strides = array<i32>} : memref<8x128xf32, #tpu.memory_space<vmem>>, vector<8x128xf32>,
    return
  }
  func.func @transform_0(%arg0: i32) -> (i32, i32) {
    %c0_i32 = arith.constant 0 : i32
    %c0_i32_0 = arith.constant 0 : i32
    return %c0_i32, %arg0 : i32, i32
  }
  func.func @transform_1(%arg0: i32) -> (i32, i32) {
    %c0_i32 = arith.constant 0 : i32
    %c0_i32_0 = arith.constant 0 : i32
    %c0_i32_1 = arith.constant 0 : i32
    return %c0_i32, %c0_i32_0 : i32, i32
  }
}

</mosaic_0001>

<bundles_post_ra>
// kernel: objective.2
= control target key start
LH: loop header
LB: loop body
LE: loop exit
PB: predicated region body
PF: predicated region fallthrough
CT: control target
= control target key end

     0   :  { %s78_s0 = inlined_call_operand.vmem [shape: f32[56,128], index: 0, kind: input, shape index: {}]   ;;  %s79_s1 = inlined_call_operand.vmem [shape: f32[8,128], index: 1, kind: output, shape index: {}]  }
   0x1   :  { %v19_v0 = vld [vmem:[%s78_s0 + $0x30] sm:$0xff]  ;;  %v8_v1 = vld [vmem:[%s78_s0] sm:$0xff]  ;;  %v9_v2 = vld [vmem:[%s78_s0 + $0x18] sm:$0xff] }
   0x2   :  { %42 = vrsqrt.f32 %v19_v0  ;;  %v11_v3 = vld [vmem:[%s78_s0 + $0x8] sm:$0xff]  ;;  %v12_v4 = vld [vmem:[%s78_s0 + $0x20] sm:$0xff]  ;;  %v10_v5 = vsub.f32 %v8_v1, %v9_v2  ;;  %v15_v7 = vld [vmem:[%s78_s0 + $0x10] sm:$0xff]  ;;  %vm22_vm0 = vcmp.eq.f32.partialorder %v19_v0, inf  ;;  %v25_v12 = vand.u32 2147483648, %v19_v0 }
   0x3   :  { %v13_v6 = vsub.f32 %v11_v3, %v12_v4  ;;  %v16_v8 = vld [vmem:[%s78_s0 + $0x28] sm:$0xff]  ;;  %vm24_vm1 = vcmp.eq.f32.partialorder %v19_v0, 0.0 }
   0x4   :  { %v17_v10 = vsub.f32 %v15_v7, %v16_v8 }
   0x5   :  { %v14_v9 = vadd.f32 %v13_v6, %v10_v5 }
   0x7   :  { %v18_v13 = vadd.f32 %v17_v10, %v14_v9 }
   0xf   :  { %v43_v11 = vpop.eup %42 }
  0x10   :  { %v21_v14 = vmul.f32 %v43_v11, %v19_v0 }
  0x12   :  { %v23_v15 = vsel %vm22_vm0, %v19_v0, %v21_v14 }
  0x13   :  { %v26_v16 = vsel %vm24_vm1, %v25_v12, %v23_v15 }
  0x14   :  { %v27_v17 = vmul.f32 %v26_v16, %v18_v13 }
  0x16   :  { %v34_v18 = vmul.f32 %v27_v17, %v27_v17 }
  0x18   :  { %36 = vst [vmem:[%s79_s1] sm:$0xff] %v34_v18 }

// kernel: objective.3
= control target key start
LH: loop header
LB: loop body
LE: loop exit
PB: predicated region body
PF: predicated region fallthrough
CT: control target
= control target key end

     0   :  { %s808_s6 = smov 0   ;;  %s810_s7 = smov 0   ;;  %s1239_s0 = inlined_call_operand.vmem [shape: f32[104,256], index: 0, kind: input, shape index: {}]   ;;  %s1240_s1 = inlined_call_operand.vmem [shape: f32[16,128], index: 1, kind: output, shape index: {}]  }
   0x1   :  { %s812_s8 = smov 0   ;;  %s814_s9 = smov 0  }
   0x2   :  { %s816_s10 = smov 0  }
   0x3 LB: > { %s23_s11 = sadd.s32 1, %s790_s9  ;;  %p39_p1 = scmp.ne.s32.totalorder %s782_s7, %s778_s6  ;;  %s794_s10 = sphi %s816_s10, %s11_s10   ;;  %s790_s9 = sphi %s814_s9, %s1253_s9   ;;  %s786_s8 = sphi %s812_s8, %s1252_s8   ;;  %s782_s7 = sphi %s810_s7, %s1251_s7   ;;  %s778_s6 = sphi %s808_s6, %s1250_s6  }
   0x4   : > { %p25_p0 = scmp.ge.s32.totalorder %s23_s11, 2  ;;  %p40_p2 = scmp.eq.s32.totalorder %s794_s10, 0 }
   0x5   : > { %s32_s13 = sadd.s32 1, %s782_s7  ;;  %p678_p5 = scmp.ge.s32.totalorder %s794_s10, 2 }
   0x6   : > { %s1255_s11 = smov (%p25_p0, %s23_s11), 0  ;;  %p41_p3 = por %p40_p2, %p39_p1 }
   0x7   : > { %s29_s12 = ssub.s32 %s790_s9, %s1255_s11  ;;  %91 = sbr.rel (%p678_p5) target bundleno = 23 (0x17), region = 16 }
   0x8   : > { %p30_p4 = scmp.eq.s32.totalorder %s29_s12, 0 }
   0xa   : > { %s843_s14 = scalar_select %p30_p4, %s782_s7, %s32_s13  }
   0xc   : > { %94 = sbr.rel (!%p41_p3) target bundleno = 23 (0x17), region = 20  ;;  %s96_s15 = sand.u32 (%p41_p3), 1, %s782_s7  }
   0xd   : > { %s679_s16 = sshll.u32 (%p41_p3), %s790_s9, 3  ;;  %s688_s17 = smul.u32 (%p41_p3), 104, %s96_s15 }
   0xe   : > { %s101_s20 = scalar_lea.vmem (%p41_p3), %s1239_s0, %s679_s16 }
   0xf   : > { %v154_v0 = vld [vmem:[%s101_s20] sm:$0xff] (%p41_p3)  ;;  %v156_v1 = vld [vmem:[%s101_s20 + $0x10] sm:$0xff] (%p41_p3)  ;;  %s98_s21 = scalar_lea.vmem (%p41_p3), [#allocation2], %s688_s17 }
  0x10   : > { %v158_v2 = vld [vmem:[%s101_s20 + $0x20] sm:$0xff] (%p41_p3)  ;;  %v160_v3 = vld [vmem:[%s101_s20 + $0x30] sm:$0xff] (%p41_p3)  ;;  %155 = vst [vmem:[%s98_s21] sm:$0xff] (%p41_p3), %v154_v0  ;;  %157 = vst [vmem:[%s98_s21 + $0x8] sm:$0xff] (%p41_p3), %v156_v1 }
  0x11   : > { %v162_v4 = vld [vmem:[%s101_s20 + $0x40] sm:$0xff]  ;;  %v164_v5 = vld [vmem:[%s101_s20 + $0x50] sm:$0xff]  ;;  %159 = vst [vmem:[%s98_s21 + $0x10] sm:$0xff] %v158_v2  ;;  %161 = vst [vmem:[%s98_s21 + $0x18] sm:$0xff] %v160_v3 }
  0x12   : > { %163 = vst [vmem:[%s98_s21 + $0x20] sm:$0xff] %v162_v4  ;;  %165 = vst [vmem:[%s98_s21 + $0x28] sm:$0xff] %v164_v5  ;;  %v166_v6 = vld [vmem:[%s101_s20 + $0x60] sm:$0xff]  ;;  %v168_v7 = vld [vmem:[%s101_s20 + $0x70] sm:$0xff] }
  0x13   : > { %v170_v8 = vld [vmem:[%s101_s20 + $0x80] sm:$0xff]  ;;  %167 = vst [vmem:[%s98_s21 + $0x30] sm:$0xff] %v166_v6  ;;  %169 = vst [vmem:[%s98_s21 + $0x38] sm:$0xff] %v168_v7  ;;  %v172_v9 = vld [vmem:[%s101_s20 + $0x90] sm:$0xff] }
  0x14   : > { %171 = vst [vmem:[%s98_s21 + $0x40] sm:$0xff] %v170_v8  ;;  %v174_v10 = vld [vmem:[%s101_s20 + $0xa0] sm:$0xff]  ;;  %v176_v11 = vld [vmem:[%s101_s20 + $0xb0] sm:$0xff]  ;;  %173 = vst [vmem:[%s98_s21 + $0x48] sm:$0xff] %v172_v9 }
  0x15   : > { %175 = vst [vmem:[%s98_s21 + $0x50] sm:$0xff] %v174_v10  ;;  %177 = vst [vmem:[%s98_s21 + $0x58] sm:$0xff] %v176_v11  ;;  %v178_v12 = vld [vmem:[%s101_s20 + $0xc0] sm:$0xff] }
  0x16   : > { %179 = vst [vmem:[%s98_s21 + $0x60] sm:$0xff] %v178_v12 }
  0x17 PF: > { %p680_p6 = scmp.ge.s32.totalorder %s794_s10, 1  ;;  %p184_p7 = scmp.lt.s32.totalorder %s794_s10, 3 }
  0x19   : > { %p185_p8 = pnand %p680_p6, %p184_p7 }
  0x1a   : > { %s191_s22 = sand.u32 (!%p185_p8), 1, %s778_s6   ;;  %p210_p9 = scmp.lt.s32.totalorder (!%p185_p8), %s786_s8, 1 }
  0x1b   : > { %188 = sbr.rel (%p185_p8) target bundleno = 183 (0xb7), region = 58 }
  0x1c   : > { %s689_s23 = smul.u32 (!%p185_p8), 104, %s191_s22 }
  0x1e   : > { %s193_s24 = scalar_lea.vmem (!%p185_p8), [#allocation2], %s689_s23 }
  0x20   : > { %v854_v13 = vld [vmem:[%s193_s24 + $0x60] sm:$0xff]  ;;  %v217_v15 = vld [vmem:[%s193_s24 + $0x8] sm:$0xff]  ;;  %v218_v16 = vld [vmem:[%s193_s24 + $0x10] sm:$0xff]  ;;  %s1257_s8 = smov (!%p210_p9, %s786_s8), 1 }
  0x21   : > { %v216_v14 = vld [vmem:[%s193_s24] sm:$0xff]  ;;  %v219_v17 = vld [vmem:[%s193_s24 + $0x18] sm:$0xff]  ;;  %v221_v19 = vld [vmem:[%s193_s24 + $0x28] sm:$0xff]  ;;  %v215_v24 = vsub.f32 1.0, %v854_v13  ;;  %s681_s25 = sshll.u32 %s1257_s8, 3 }
  0x22   : > { %v220_v18 = vld [vmem:[%s193_s24 + $0x20] sm:$0xff]  ;;  %v222_v20 = vld [vmem:[%s193_s24 + $0x30] sm:$0xff]  ;;  %v223_v21 = vld [vmem:[%s193_s24 + $0x38] sm:$0xff]  ;;  %v228_v22 = vsub.f32 %v219_v17, %v216_v14  ;;  %v230_v27 = vsub.f32 %v221_v19, %v218_v16  ;;  %s213_s28 = scalar_lea.vmem %s1240_s1, %s681_s25 }
  0x23   : > { %v229_v23 = vsub.f32 %v220_v18, %v217_v15  ;;  %v224_v25 = vld [vmem:[%s193_s24 + $0x40] sm:$0xff]  ;;  %v225_v26 = vld [vmem:[%s193_s24 + $0x48] sm:$0xff]  ;;  %v241_v28 = vsub.f32 %v222_v20, %v219_v17  ;;  %v242_v29 = vsub.f32 %v223_v21, %v220_v18  ;;  %v226_v30 = vld [vmem:[%s193_s24 + $0x50] sm:$0xff] }
  0x24   : > { %v231_v31 = vmul.f32 %v228_v22, %v228_v22  ;;  %v243_v33 = vsub.f32 %v224_v25, %v221_v19  ;;  %v254_v34 = vsub.f32 %v225_v26, %v222_v20  ;;  %v227_v35 = vld [vmem:[%s193_s24 + $0x58] sm:$0xff]  ;;  %v234_v36 = vmul.f32 %v230_v27, %v230_v27 }
  0x25   : > { %v232_v32 = vmul.f32 %v229_v23, %v229_v23  ;;  %v244_v37 = vmul.f32 %v241_v28, %v241_v28  ;;  %v245_v38 = vmul.f32 %v242_v29, %v242_v29  ;;  %v255_v39 = vsub.f32 %v226_v30, %v223_v21 }
  0x26   : > { %v247_v41 = vmul.f32 %v243_v33, %v243_v33  ;;  %v256_v42 = vsub.f32 %v227_v35, %v224_v25  ;;  %v257_v43 = vmul.f32 %v254_v34, %v254_v34  ;;  %v267_v46 = vsub.f32 %v216_v14, %v225_v26 }
  0x27   : > { %v233_v40 = vadd.f32 %v232_v32, %v231_v31  ;;  %v246_v44 = vadd.f32 %v245_v38, %v244_v37  ;;  %v258_v45 = vmul.f32 %v255_v39, %v255_v39  ;;  %v268_v47 = vsub.f32 %v217_v15, %v226_v30 }
  0x28   : > { %v260_v49 = vmul.f32 %v256_v42, %v256_v42  ;;  %v269_v50 = vsub.f32 %v218_v16, %v227_v35  ;;  %v270_v53 = vmul.f32 %v267_v46, %v267_v46 }
  0x29   : > { %v235_v48 = vadd.f32 %v234_v36, %v233_v40  ;;  %v248_v51 = vadd.f32 %v247_v41, %v246_v44  ;;  %v259_v52 = vadd.f32 %v258_v45, %v257_v43  ;;  %v271_v54 = vmul.f32 %v268_v47, %v268_v47 }
  0x2a   : > { %v273_v56 = vmul.f32 %v269_v50, %v269_v50 }
  0x2b   : > { %v236_v55 = vadd.f32 %v235_v48, %v215_v24  ;;  %v249_v57 = vadd.f32 %v248_v51, %v215_v24  ;;  %v261_v58 = vadd.f32 %v260_v49, %v259_v52  ;;  %v272_v59 = vadd.f32 %v271_v54, %v270_v53 }
  0x2d   : > { %732 = vrsqrt.f32 %v236_v55  ;;  %v262_v60 = vadd.f32 %v261_v58, %v215_v24  ;;  %v274_v61 = vadd.f32 %v273_v56, %v272_v59 }
  0x2e   : > { %734 = vrsqrt.f32 %v249_v57 }
  0x2f   : > { %736 = vrsqrt.f32 %v262_v60  ;;  %v275_v62 = vadd.f32 %v274_v61, %v215_v24 }
  0x31   : > { %738 = vrsqrt.f32 %v275_v62 }
  0x3a   : > { %v733_v63 = vpop.eup %732 }
  0x3b   : > { %v735_v0 = vpop.eup %734  ;;  %v857_v1 = vmul.f32 %v733_v63, %v228_v22  ;;  %v865_v6 = vmul.f32 %v733_v63, %v229_v23  ;;  %v867_v7 = vmul.f32 %v733_v63, %v230_v27 }
  0x3c   : > { %v859_v2 = vmul.f32 %v735_v0, %v241_v28  ;;  %v861_v3 = vmul.f32 %v735_v0, %v242_v29  ;;  %v863_v4 = vmul.f32 %v735_v0, %v243_v33  ;;  %v737_v5 = vpop.eup %736 }
  0x3d   : > { %v869_v8 = vmul.f32 %v737_v5, %v254_v34  ;;  %v871_v9 = vmul.f32 %v737_v5, %v255_v39  ;;  %v873_v10 = vmul.f32 %v737_v5, %v256_v42 }
  0x3e   : > { %v345_v11 = vmul.f32 %v859_v2, %v857_v1  ;;  %v739_v12 = vpop.eup %738  ;;  %v346_v14 = vmul.f32 %v861_v3, %v865_v6  ;;  %v348_v15 = vmul.f32 %v863_v4, %v867_v7 }
  0x3f   : > { %v881_v16 = vmul.f32 %v739_v12, %v267_v46  ;;  %v883_v17 = vmul.f32 %v739_v12, %v268_v47  ;;  %v885_v18 = vmul.f32 %v739_v12, %v269_v50  ;;  %v410_v19 = vmul.f32 %v869_v8, %v859_v2 }
  0x40   : > { %v347_v20 = vadd.f32 %v346_v14, %v345_v11  ;;  %v411_v21 = vmul.f32 %v871_v9, %v861_v3  ;;  %v413_v22 = vmul.f32 %v873_v10, %v863_v4  ;;  %v895_v23 = vmul.f32 %v873_v10, %v861_v3 }
  0x41   : > { %v280_v24 = vmul.f32 %v881_v16, %v857_v1  ;;  %v281_v25 = vmul.f32 %v883_v17, %v865_v6  ;;  %v283_v26 = vmul.f32 %v885_v18, %v867_v7  ;;  %v475_v27 = vmul.f32 %v881_v16, %v869_v8 }
  0x42   : > { %v349_v28 = vadd.f32 %v348_v15, %v347_v20  ;;  %v412_v29 = vadd.f32 %v411_v21, %v410_v19  ;;  %v476_v30 = vmul.f32 %v883_v17, %v871_v9  ;;  %v478_v31 = vmul.f32 %v885_v18, %v873_v10 }
  0x43   : > { %v282_v32 = vadd.f32 %v281_v25, %v280_v24  ;;  %v541_v33 = vmul.f32 %v871_v9, %v863_v4  ;;  %v543_v34 = vmul.f32 %v869_v8, %v863_v4  ;;  %v544_v35 = vmul.f32 %v873_v10, %v859_v2 }
  0x44   : > { %v350_v36 = vsub.f32 0.0, %v349_v28  ;;  %v414_v37 = vadd.f32 %v413_v22, %v412_v29  ;;  %v477_v38 = vadd.f32 %v476_v30, %v475_v27  ;;  %v546_v39 = vmul.f32 %v871_v9, %v859_v2 }
  0x45   : > { %v284_v40 = vadd.f32 %v283_v26, %v282_v32  ;;  %v542_v41 = vsub.f32 %v895_v23, %v541_v33  ;;  %v545_v42 = vsub.f32 %v543_v34, %v544_v35  ;;  %v547_v43 = vmul.f32 %v869_v8, %v861_v3 }
  0x46   : > { %v920_v44 = vclamps-f32 %v350_v36, 1.0  ;;  %v415_v45 = vsub.f32 0.0, %v414_v37  ;;  %v549_v46 = vmul.f32 %v885_v18, %v861_v3  ;;  %v550_v49 = vmul.f32 %v883_v17, %v863_v4 }
  0x47   : > { %v285_v47 = vsub.f32 0.0, %v284_v40  ;;  %v548_v48 = vsub.f32 %v546_v39, %v547_v43  ;;  %v552_v50 = vmul.f32 %v881_v16, %v863_v4  ;;  %v479_v53 = vadd.f32 %v478_v31, %v477_v38 }
  0x48   : > { %v353_v51 = vmul.f32 %v920_v44, %v920_v44  ;;  %v932_v55 = vclamps-f32 %v415_v45, 1.0  ;;  %v551_v62 = vsub.f32 %v549_v46, %v550_v49  ;;  %v946_v0 = vand.u32 2147483647, %v920_v44 }
  0x49   : > { %v930_v52 = vclamps-f32 %v285_v47, 1.0  ;;  %v480_v58 = vsub.f32 0.0, %v479_v53  ;;  %v553_v5 = vmul.f32 %v885_v18, %v859_v2  ;;  %v555_v14 = vmul.f32 %v883_v17, %v859_v2 }
  0x4a   : > { %v354_v54 = vsub.f32 1.0, %v353_v51  ;;  %v418_v59 = vmul.f32 %v932_v55, %v932_v55  ;;  %v556_v15 = vmul.f32 %v881_v16, %v861_v3  ;;  %v558_v20 = vmul.f32 %v885_v18, %v871_v9 }
  0x4b   : > { %v288_v56 = vmul.f32 %v930_v52, %v930_v52  ;;  %v940_v61 = vclamps-f32 %v480_v58, 1.0  ;;  %v554_v19 = vsub.f32 %v552_v50, %v553_v5  ;;  %v559_v21 = vmul.f32 %v883_v17, %v873_v10 }
  0x4c   : > { %740 = vrsqrt.f32 %v354_v54  ;;  %v938_v60 = vsub.f32 1.0, %v418_v59  ;;  %vm357_vm0 = vcmp.eq.f32.partialorder %v354_v54, inf  ;;  %vm359_vm1 = vcmp.eq.f32.partialorder %v354_v54, 0.0 }
  0x4d   : > { %v289_v57 = vsub.f32 1.0, %v288_v56  ;;  %v483_v63 = vmul.f32 %v940_v61, %v940_v61  ;;  %v360_v11 = vand.u32 2147483648, %v354_v54  ;;  %v561_v22 = vmul.f32 %v881_v16, %v873_v10 }
  0x4e   : > { %v557_v24 = vsub.f32 %v555_v14, %v556_v15  ;;  %v560_v25 = vsub.f32 %v558_v20, %v559_v21  ;;  %v562_v26 = vmul.f32 %v885_v18, %v869_v8  ;;  %v564_v27 = vmul.f32 %v883_v17, %v869_v8 }
  0x4f   : > { %742 = vrsqrt.f32 %v289_v57  ;;  %v950_v12 = vsub.f32 1.0, %v483_v63  ;;  %vm292_vm2 = vcmp.eq.f32.partialorder %v289_v57, inf  ;;  %vm294_vm3 = vcmp.eq.f32.partialorder %v289_v57, 0.0 }
  0x50   : > { %744 = vrsqrt.f32 %v938_v60  ;;  %v295_v23 = vand.u32 2147483648, %v289_v57  ;;  %v565_v29 = vmul.f32 %v881_v16, %v871_v9  ;;  %v567_v30 = vmul.f32 %v542_v41, %v857_v1 }
  0x51   : > { %746 = vrsqrt.f32 %v950_v12  ;;  %v568_v10 = vmul.f32 %v545_v42, %v865_v6  ;;  %v570_v31 = vmul.f32 %v548_v48, %v867_v7  ;;  %v563_v33 = vsub.f32 %v561_v22, %v562_v26 }
  0x52   : > { %v572_v34 = vmul.f32 %v551_v62, %v857_v1  ;;  %v573_v35 = vmul.f32 %v554_v19, %v865_v6  ;;  %v566_v18 = vsub.f32 %v564_v27, %v565_v29  ;;  %v575_v8 = vmul.f32 %v557_v24, %v867_v7 }
  0x53   : > { %v569_v36 = vadd.f32 %v568_v10, %v567_v30  ;;  %v577_v17 = vmul.f32 %v560_v25, %v857_v1  ;;  %v578_v38 = vmul.f32 %v563_v33, %v865_v6  ;;  %v582_v39 = vmul.f32 %v560_v25, %v859_v2 }
  0x54   : > { %v574_v16 = vadd.f32 %v573_v35, %v572_v34  ;;  %v580_v43 = vmul.f32 %v566_v18, %v867_v7  ;;  %v984_v45 = vand.u32 2147483647, %v930_v52  ;;  %v583_v2 = vmul.f32 %v563_v33, %v861_v3 }
  0x55   : > { %v571_v42 = vadd.f32 %v570_v31, %v569_v36  ;;  %v579_v6 = vadd.f32 %v578_v38, %v577_v17  ;;  %vm422_vm4 = vcmp.eq.f32.partialorder %v938_v60, inf  ;;  %v425_v51 = vand.u32 2147483648, %v938_v60 }
  0x56   : > { %v576_v48 = vadd.f32 %v575_v8, %v574_v16  ;;  %vm424_vm5 = vcmp.eq.f32.partialorder %v938_v60, 0.0  ;;  %v1006_v56 = vand.u32 2147483647, %v932_v55  ;;  %vm487_vm6 = vcmp.eq.f32.partialorder %v950_v12, inf }
  0x57   : > { %v584_v62 = vadd.f32 %v583_v2, %v582_v39  ;;  %v585_v63 = vmul.f32 %v566_v18, %v863_v4  ;;  %v587_v5 = vmul.f32 %v571_v42, %v571_v42  ;;  %vm489_vm7 = vcmp.eq.f32.partialorder %v950_v12, 0.0 }
  0x58   : > { %v588_v15 = vmul.f32 %v576_v48, %v576_v48  ;;  %vm392_vm8 = vcmp.lt.s32.totalorder %v920_v44, 0  ;;  %vm389_vm9 = vcmp.lt.f32.partialorder %v920_v44, 0.0  ;;  %vm327_vm10 = vcmp.lt.s32.totalorder %v930_v52, 0 }
  0x59   : > { %v741_v28 = vpop.eup %740  ;;  %v586_v21 = vadd.f32 %v585_v63, %v584_v62  ;;  %vm396_vm11 = vcmp.ne.f32.partialorder %v920_v44, %v920_v44  ;;  %vm402_vm12 = vcmp.eq.s32.totalorder %v946_v0, inf  ;;  %vm324_vm13 = vcmp.lt.f32.partialorder %v930_v52, 0.0 }
  0x5a   : > { %v356_v32 = vmul.f32 %v741_v28, %v354_v54  ;;  %v589_v22 = vadd.f32 %v588_v15, %v587_v5  ;;  %vm1241_vm14 = vcmp.lt.f32.partialorder %v932_v55, 0.0  ;;  %vm457_vm15 = vcmp.lt.s32.totalorder %v932_v55, 0 }
  0x5b   : > { %v592_v26 = vmul.f32 %v586_v21, %v586_v21 }
  0x5c   : > { %v743_v37 = vpop.eup %742  ;;  %v358_v9 = vsel %vm357_vm0, %v354_v54, %v356_v32  ;;  %v581_v54 = vadd.f32 %v580_v43, %v579_v6  ;;  %vm337_vm0 = vcmp.eq.s32.totalorder %v984_v45, inf }
  0x5d   : > { %v291_v40 = vmul.f32 %v743_v37, %v289_v57  ;;  %v980_v41 = vsel %vm359_vm1, %v360_v11, %v358_v9  ;;  %v745_v46 = vpop.eup %744 }
  0x5e   : > { %v987_v1 = vand.u32 2147483647, %v980_v41  ;;  %v421_v53 = vmul.f32 %v745_v46, %v938_v60  ;;  %v747_v58 = vpop.eup %746 }
  0x5f   : > { %v293_v47 = vsel %vm292_vm2, %v289_v57, %v291_v40  ;;  %v490_v57 = vand.u32 2147483648, %v950_v12  ;;  %v486_v14 = vmul.f32 %v747_v58, %v950_v12  ;;  %vm331_vm2 = vcmp.ne.f32.partialorder %v930_v52, %v930_v52 }
  0x60   : > { %v992_v49 = vsel %vm294_vm3, %v295_v23, %v293_v47  ;;  %v365_v50 = vmax.f32 %v946_v0, %v987_v1  ;;  %v423_v59 = vsel %vm422_vm4, %v938_v60, %v421_v53  ;;  %v590_v60 = vmul.f32 %v581_v54, %v581_v54 }
  0x61   : > { %v997_v7 = vand.u32 2147483647, %v992_v49  ;;  %v1012_v11 = vsel %vm424_vm5, %v425_v51, %v423_v59  ;;  %v488_v20 = vsel %vm487_vm6, %v950_v12, %v486_v14  ;;  %v1023_v23 = vand.u32 2147483647, %v940_v61 }
  0x62   : > { %748 = vrcp.f32 %v365_v50  ;;  %v1016_v19 = vand.u32 2147483647, %v1012_v11  ;;  %v1025_v24 = vsel %vm489_vm7, %v490_v57, %v488_v20  ;;  %v591_v25 = vadd.f32 %v590_v60, %v589_v22 }
  0x63   : > { %v300_v3 = vmax.f32 %v984_v45, %v997_v7  ;;  %v1028_v27 = vand.u32 2147483647, %v1025_v24  ;;  %v364_v12 = vmin.f32 %v946_v0, %v987_v1  ;;  %v299_v10 = vmin.f32 %v984_v45, %v997_v7 }
  0x64   : > { %v430_v4 = vmax.f32 %v1006_v56, %v1016_v19  ;;  %v1030_v28 = vadd.f32 %v592_v26, %v591_v25  ;;  %v429_v18 = vmin.f32 %v1006_v56, %v1016_v19  ;;  %vm386_vm1 = vcmp.gt.f32.partialorder %v987_v1, %v946_v0 }
  0x65   : > { %750 = vrcp.f32 %v300_v3  ;;  %v495_v29 = vmax.f32 %v1023_v23, %v1028_v27  ;;  %v494_v38 = vmin.f32 %v1023_v23, %v1028_v27  ;;  %vm397_vm3 = vcmp.ne.f32.partialorder %v980_v41, %v980_v41 }
  0x66   : > { %752 = vrcp.f32 %v430_v4  ;;  %vm403_vm4 = vcmp.eq.s32.totalorder %v987_v1, inf  ;;  %vm461_vm5 = vcmp.ne.f32.partialorder %v932_v55, %v932_v55  ;;  %vm321_vm6 = vcmp.gt.f32.partialorder %v997_v7, %v984_v45 }
  0x67   : > { %754 = vrcp.f32 %v495_v29  ;;  %vm394_vm7 = vcmp.eq.f32.partialorder %v980_v41, 0.0  ;;  %v342_v0 = vand.u32 2147483648, %v992_v49 }
  0x6f   : > { %v749_v30 = vpop.eup %748 }
  0x70   : > { %v1038_v31 = vmul.f32 %v749_v30, %v364_v12 }
  0x72   : > { %v751_v32 = vpop.eup %750  ;;  %v368_v33 = vmul.f32 %v1038_v31, %v1038_v31 }
  0x73   : > { %v1042_v34 = vmul.f32 %v751_v32, %v299_v10  ;;  %v753_v17 = vpop.eup %752 }
  0x74   : > { %v369_v35 = vmul.f32 0.002785687, %v368_v33  ;;  %v1051_v16 = vmul.f32 %v753_v17, %v429_v18  ;;  %v755_v43 = vpop.eup %754 }
  0x75   : > { %v1048_v36 = vmul.f32 %v1042_v34, %v1042_v34  ;;  %v1061_v6 = vmul.f32 %v755_v43, %v494_v38 }
  0x76   : > { %v370_v8 = vadd.f32 -0.015866, %v369_v35  ;;  %v1057_v42 = vmul.f32 %v1051_v16, %v1051_v16 }
  0x77   : > { %v304_v37 = vmul.f32 0.002785687, %v1048_v36  ;;  %v1065_v53 = vmul.f32 %v1061_v6, %v1061_v6 }
  0x78   : > { %v371_v9 = vmul.f32 %v370_v8, %v368_v33  ;;  %v434_v48 = vmul.f32 0.002785687, %v1057_v42 }
  0x79   : > { %v305_v39 = vadd.f32 -0.015866, %v304_v37  ;;  %v499_v58 = vmul.f32 0.002785687, %v1065_v53 }
  0x7a   : > { %v372_v40 = vadd.f32 0.04247222, %v371_v9  ;;  %v435_v51 = vadd.f32 -0.015866, %v434_v48 }
  0x7b   : > { %v306_v46 = vmul.f32 %v305_v39, %v1048_v36  ;;  %v500_v5 = vadd.f32 -0.015866, %v499_v58 }
  0x7c   : > { %v373_v47 = vmul.f32 %v372_v40, %v368_v33  ;;  %v436_v57 = vmul.f32 %v435_v51, %v1057_v42 }
  0x7d   : > { %v307_v2 = vadd.f32 0.04247222, %v306_v46  ;;  %v501_v21 = vmul.f32 %v500_v5, %v1065_v53 }
  0x7e   : > { %v374_v50 = vadd.f32 -0.074975304, %v373_v47  ;;  %v437_v63 = vadd.f32 0.04247222, %v436_v57  ;;  %v796_v47 = vmov 0.0  }
  0x7f   : > { %v308_v54 = vmul.f32 %v307_v2, %v1048_v36  ;;  %v502_v25 = vadd.f32 0.04247222, %v501_v21  ;;  %v393_v48 = vsel %vm392_vm8, 3.1415927, %v796_v47  ;;  %vm338_vm8 = vcmp.eq.s32.totalorder %v997_v7, inf }
  0x80   : > { %v375_v3 = vmul.f32 %v374_v50, %v368_v33  ;;  %v438_v20 = vmul.f32 %v437_v63, %v1057_v42  ;;  %v328_v63 = vsel %vm327_vm10, 3.1415927, %v796_v47  ;;  %vm332_vm10 = vcmp.ne.f32.partialorder %v992_v49, %v992_v49 }
  0x81   : > { %v309_v59 = vadd.f32 -0.074975304, %v308_v54  ;;  %v503_v30 = vmul.f32 %v502_v25, %v1065_v53  ;;  %v458_v25 = vsel %vm457_vm15, 3.1415927, %v796_v47  ;;  %vm1133_vm15 = vmor %vm396_vm11, %vm397_vm3  ;;  %vm519_vm3 = vcmp.lt.f32.partialorder %v940_v61, 0.0 }
  0x82   : > { %v376_v62 = vadd.f32 0.1064488, %v375_v3  ;;  %v439_v4 = vadd.f32 -0.074975304, %v438_v20  ;;  %v797_v3 = vmov 0.7853982   ;;  %vm404_vm11 = vmand %vm402_vm12, %vm403_vm4  ;;  %vm451_vm12 = vcmp.gt.f32.partialorder %v1016_v19, %v1006_v56 }
  0x83   : > { %v310_v14 = vmul.f32 %v309_v59, %v1048_v36  ;;  %v504_v18 = vadd.f32 -0.074975304, %v503_v30  ;;  %v401_v57 = vsel %vm389_vm9, 2.3561945, %v797_v3  ;;  %v336_v5 = vsel %vm324_vm13, 2.3561945, %v797_v3  ;;  %vm339_vm4 = vmand %vm337_vm0, %vm338_vm8 }
  0x84   : > { %v377_v15 = vmul.f32 %v376_v62, %v368_v33  ;;  %v440_v29 = vmul.f32 %v439_v4, %v1057_v42  ;;  %v407_v7 = vand.u32 2147483648, %v980_v41  ;;  %vm1249_vm8 = vcmp.eq.s32.totalorder %v1006_v56, inf }
  0x85   : > { %v311_v22 = vadd.f32 0.1064488, %v310_v14  ;;  %v505_v9 = vmul.f32 %v504_v18, %v1065_v53  ;;  %v472_v56 = vand.u32 2147483648, %v1012_v11 }
  0x86   : > { %v378_v60 = vadd.f32 -0.14207031, %v377_v15  ;;  %v441_v35 = vadd.f32 0.1064488, %v440_v29 }
  0x87   : > { %v312_v26 = vmul.f32 %v311_v22, %v1048_v36  ;;  %v506_v43 = vadd.f32 0.1064488, %v505_v9 }
  0x88   : > { %v379_v12 = vmul.f32 %v378_v60, %v368_v33  ;;  %v442_v37 = vmul.f32 %v441_v35, %v1057_v42 }
  0x89   : > { %v313_v10 = vadd.f32 -0.14207031, %v312_v26  ;;  %v507_v51 = vmul.f32 %v506_v43, %v1065_v53 }
  0x8a   : > { %v380_v32 = vadd.f32 0.19993454, %v379_v12  ;;  %v443_v40 = vadd.f32 -0.14207031, %v442_v37 }
  0x8b   : > { %v314_v8 = vmul.f32 %v313_v10, %v1048_v36  ;;  %v508_v59 = vadd.f32 -0.14207031, %v507_v51 }
  0x8c   : > { %v381_v17 = vmul.f32 %v380_v32, %v368_v33  ;;  %v444_v50 = vmul.f32 %v443_v40, %v1057_v42 }
  0x8d   : > { %v315_v38 = vadd.f32 0.19993454, %v314_v8  ;;  %v509_v20 = vmul.f32 %v508_v59, %v1065_v53 }
  0x8e   : > { %v382_v39 = vadd.f32 -0.33333147, %v381_v17 }
  0x8f   : > { %v316_v46 = vmul.f32 %v315_v38, %v1048_v36  ;;  %v510_v60 = vadd.f32 0.19993454, %v509_v20  ;;  %v537_v20 = vand.u32 2147483648, %v1025_v24 }
  0x90   : > { %v383_v2 = vmul.f32 %v382_v39, %v368_v33  ;;  %v445_v33 = vadd.f32 0.19993454, %v444_v50 }
  0x91   : > { %v317_v54 = vadd.f32 -0.33333147, %v316_v46  ;;  %v511_v29 = vmul.f32 %v510_v60, %v1065_v53 }
  0x92   : > { %v384_v58 = vmul.f32 %v383_v2, %v1038_v31  ;;  %v446_v15 = vmul.f32 %v445_v33, %v1057_v42 }
  0x93   : > { %v318_v62 = vmul.f32 %v317_v54, %v1048_v36  ;;  %v1111_v36 = vsel %vm1241_vm14, 2.3561945, %v797_v3  ;;  %v512_v32 = vadd.f32 -0.33333147, %v511_v29  ;;  %vm329_vm14 = vcmp.eq.f32.partialorder %v992_v49, 0.0 }
  0x94   : > { %v385_v14 = vadd.f32 %v384_v58, %v1038_v31  ;;  %v447_v22 = vadd.f32 -0.33333147, %v446_v15 }
  0x95   : > { %v319_v21 = vmul.f32 %v318_v62, %v1042_v34  ;;  %v513_v9 = vmul.f32 %v512_v32, %v1065_v53 }
  0x96   : > { %v387_v31 = vsub.f32 1.5707964, %v385_v14  ;;  %v448_v12 = vmul.f32 %v447_v22, %v1057_v42 }
  0x97   : > { %v320_v4 = vadd.f32 %v319_v21, %v1042_v34  ;;  %v514_v39 = vmul.f32 %v513_v9, %v1061_v6 }
  0x98   : > { %v388_v26 = vsel %vm386_vm1, %v387_v31, %v385_v14  ;;  %v449_v42 = vmul.f32 %v448_v12, %v1051_v16  ;;  %vm522_vm1 = vcmp.lt.s32.totalorder %v940_v61, 0 }
  0x99   : > { %v322_v30 = vsub.f32 1.5707964, %v320_v4  ;;  %v390_v34 = vsub.f32 3.1415927, %v388_v26  ;;  %v515_v45 = vadd.f32 %v514_v39, %v1061_v6 }
  0x9a   : > { %v450_v37 = vadd.f32 %v449_v42, %v1051_v16 }
  0x9b   : > { %v323_v35 = vsel %vm321_vm6, %v322_v30, %v320_v4  ;;  %v391_v18 = vsel %vm389_vm9, %v390_v34, %v388_v26  ;;  %vm1156_vm9 = vmor %vm331_vm2, %vm332_vm10  ;;  %vm459_vm2 = vcmp.eq.f32.partialorder %v1012_v11, 0.0  ;;  %vm462_vm6 = vcmp.ne.f32.partialorder %v1012_v11, %v1012_v11 }
  0x9c   : > { %v325_v8 = vsub.f32 3.1415927, %v323_v35  ;;  %v395_v17 = vsel %vm394_vm7, %v393_v48, %v391_v18  ;;  %v452_v38 = vsub.f32 1.5707964, %v450_v37  ;;  %vm1185_vm0 = vmor %vm461_vm5, %vm462_vm6  ;;  %v517_v51 = vsub.f32 1.5707964, %v515_v45 }
  0x9d   : > { %v399_v1 = vsel %vm1133_vm15, nan, %v395_v17  ;;  %vm1248_vm7 = vcmp.lt.f32.partialorder %v932_v55, 0.0  ;;  %vm526_vm15 = vcmp.ne.f32.partialorder %v940_v61, %v940_v61  ;;  %vm527_vm5 = vcmp.ne.f32.partialorder %v1025_v24, %v1025_v24 }
  0x9e   : > { %v326_v16 = vsel %vm324_vm13, %v325_v8, %v323_v35  ;;  %v405_v53 = vsel %vm404_vm11, %v401_v57, %v399_v1  ;;  %v453_v41 = vsel %vm451_vm12, %v452_v38, %v450_v37  ;;  %vm468_vm13 = vcmp.eq.s32.totalorder %v1016_v19, inf  ;;  %vm528_vm12 = vmor %vm526_vm15, %vm527_vm5 }
  0x9f   : > { %v330_v40 = vsel %vm329_vm14, %v328_v63, %v326_v16  ;;  %v406_v43 = vand.u32 2147483647, %v405_v53  ;;  %v455_v2 = vsub.f32 3.1415927, %v453_v41  ;;  %vm516_vm14 = vcmp.gt.f32.partialorder %v1028_v27, %v1023_v23  ;;  %vm469_vm10 = vmand %vm1249_vm8, %vm468_vm13 }
  0xa0   : > { %v334_v52 = vsel %vm1156_vm9, nan, %v330_v40  ;;  %v523_v19 = vsel %vm522_vm1, 3.1415927, %v796_v47  ;;  %vm532_vm11 = vcmp.eq.s32.totalorder %v1023_v23, inf  ;;  %v518_v58 = vsel %vm516_vm14, %v517_v51, %v515_v45 }
  0xa1   : > { %v340_v46 = vsel %vm339_vm4, %v336_v5, %v334_v52  ;;  %v408_v48 = vor.u32 %v407_v7, %v406_v43  ;;  %v456_v6 = vsel %vm1248_vm7, %v455_v2, %v453_v41  ;;  %vm533_vm1 = vcmp.eq.s32.totalorder %v1028_v27, inf }
  0xa2   : > { %v341_v49 = vand.u32 2147483647, %v340_v46  ;;  %v460_v57 = vsel %vm459_vm2, %v458_v25, %v456_v6  ;;  %v520_v47 = vsub.f32 3.1415927, %v518_v58  ;;  %vm524_vm9 = vcmp.eq.f32.partialorder %v1025_v24, 0.0  ;;  %vm534_vm4 = vmand %vm532_vm11, %vm533_vm1 }
  0xa3   : > { %v464_v55 = vsel %vm1185_vm0, nan, %v460_v57  ;;  %v531_v27 = vsel %vm519_vm3, 2.3561945, %v797_v3  ;;  %v596_v61 = vmul.f32 0.027777778, %v1030_v28 }
  0xa4   : > { %v343_v54 = vor.u32 %v342_v0, %v341_v49  ;;  %v470_v59 = vsel %vm469_vm10, %v1111_v36, %v464_v55  ;;  %v521_v63 = vsel %vm519_vm3, %v520_v47, %v518_v58 }
  0xa5   : > { %v471_v62 = vand.u32 2147483647, %v470_v59  ;;  %v525_v5 = vsel %vm524_vm9, %v523_v19, %v521_v63 }
  0xa6   : > { %v344_v33 = vadd.f32 -6.2831855, %v343_v54  ;;  %v529_v15 = vsel %vm528_vm12, nan, %v525_v5 }
  0xa7   : > { %v473_v14 = vor.u32 %v472_v56, %v471_v62  ;;  %v535_v21 = vsel %vm534_vm4, %v531_v27, %v529_v15 }
  0xa8   : > { %v409_v11 = vadd.f32 %v408_v48, %v344_v33  ;;  %v536_v31 = vand.u32 2147483647, %v535_v21 }
  0xaa   : > { %v474_v36 = vadd.f32 %v473_v14, %v409_v11  ;;  %v538_v22 = vor.u32 %v537_v20, %v536_v31 }
  0xac   : > { %v539_v60 = vadd.f32 %v538_v22, %v474_v36 }
  0xae   : > { %v594_v4 = vmul.f32 %v539_v60, %v539_v60 }
  0xb0   : > { %v595_v3 = vmul.f32 0.055555556, %v594_v4 }
  0xb2   : > { %v597_v23 = vadd.f32 %v596_v61, %v595_v3 }
  0xb4   : > { %v598_v25 = vmul.f32 %v597_v23, %v854_v13 }
  0xb6   : > { %606 = vst [vmem:[%s213_s28] sm:$0xff] %v598_v25 }
  0xb7 PF: > { %s11_s10 = sadd.s32 1, %s794_s10   ;;  %s1250_s6 = smov %s782_s7 }
  0xb8   : > { %p8_p10 = scmp.ge.s32.totalorder %s11_s10, 4   ;;  %s1251_s7 = smov %s843_s14 }
  0xb9   : > { %s1252_s8 = smov %s790_s9  ;;  %s1253_s9 = smov %s1255_s11 }
  0xba   :  { %10 = sbr.rel (!%p8_p10) target bundleno = 3 (0x3), region = 101 }

</bundles_post_ra>
